<compile_context>
chip_gen: v7x
topology: tpu7x:2x2x1
jax: 0.10.0
libtpu: 0.0.40
codegen_flags: <defaults>
</compile_context>

<pallas_src>
import jax
import jax.numpy as jnp
from jax.experimental import pallas as pl
from jax.experimental.pallas import tpu as pltpu


def _tree_max(slabs):
    """Log2-depth pairwise max over a list of equal-shape arrays (keeps VPU fed)."""
    while len(slabs) > 1:
        nxt = [jnp.maximum(slabs[i], slabs[i + 1]) for i in range(0, len(slabs) - 1, 2)]
        if len(slabs) % 2:
            nxt.append(slabs[-1])
        slabs = nxt
    return slabs[0]


def _make_cnn_kernel(chunk_seq, n_chunks, bsz_blk, n_blk):
    chunk_rows = chunk_seq * bsz_blk

    def kernel(x_ref, w_ref, b_ref, o_ref):
        # x_ref: (seq_tile, bsz_blk, emb)  with seq_tile = n_chunks * chunk_seq
        # w_ref: (emb, n_blk)   im2col'd conv weight
        # b_ref: (1, n_blk)     lane-layout bias
        # o_ref: (bsz_blk, n_blk) pooled output, resident across seq tiles
        k = pl.program_id(2)

        @pl.when(k == 0)
        def _init():
            o_ref[...] = jnp.full(o_ref.shape, -jnp.inf, dtype=o_ref.dtype)

        w = w_ref[...]

        def chunk_max(xc):
            # xc: (chunk_seq, bsz_blk, emb).  Collapsing the leading dims is layout-free
            # because bsz_blk is a sublane multiple.
            y = jnp.dot(xc.reshape(chunk_rows, xc.shape[-1]), w,
                        preferred_element_type=jnp.float32)          # (chunk_rows, n_blk)
            y3 = y.reshape(chunk_seq, bsz_blk, n_blk)
            # Per-batch max over this chunk's seq positions: log-depth tree (VPU).
            return _tree_max([y3[s] for s in range(chunk_seq)])       # (bsz_blk, n_blk)

        if n_chunks == 1:
            m = chunk_max(x_ref[...])
        else:
            init = jnp.full((bsz_blk, n_blk), -jnp.inf, jnp.float32)

            def body(c, carry):
                s0 = pl.multiple_of(c * chunk_seq, chunk_seq)
                return jnp.maximum(carry, chunk_max(x_ref[pl.ds(s0, chunk_seq), :, :]))

            m = jax.lax.fori_loop(0, n_chunks, body, init, unroll=(n_chunks <= 8))

        o_ref[...] = jnp.maximum(o_ref[...], m)

        @pl.when(k == pl.num_programs(2) - 1)
        def _finalize():
            # Bias is constant along the pooled (seq) axis: max(s) + b == max(s + b).
            o_ref[...] = o_ref[...] + b_ref[...]

    return kernel


def _pick_batch_block(bsz_pad):
    """Largest multiple of 8 dividing bsz_pad, <=256, giving >=2 blocks when possible."""
    if bsz_pad <= 8:
        return bsz_pad
    limit = min(256, bsz_pad // 2)            # >=2 "parallel" blocks for v7x's 2 TCs
    for cand in range(limit - limit % 8, 7, -8):
        if bsz_pad % cand == 0:
            return cand
    return 8


def cnn_forward(x, weight, bias, *, compute_dtype=jnp.bfloat16):
    """x: (seq_len, bsz, emb); weight: (num_filters, filter_height); bias: (num_filters,)."""
    seq_len, bsz, emb = x.shape
    nf, fh = weight.shape
    h_out = emb - fh + 1
    n = nf * h_out
    itemsize = jnp.dtype(compute_dtype).itemsize

    # ---- column (window, filter) axis: lane-pad to 128; single block when it fits ----
    n_pad = ((n + 127) // 128) * 128
    if n_pad * emb * itemsize <= 4 * 1024 * 1024 and n_pad <= 2048:
        n_blk = n_pad                          # one column block -> x read from HBM once
    else:
        n_blk = 512                            # full MXU lanes; pad n_pad up, never shrink
        n_pad = ((n_pad + n_blk - 1) // n_blk) * n_blk

    # im2col the conv weight: column h*nf + f holds weight[f, :] at rows h .. h+fh-1.
    wt = weight.astype(jnp.float32).T          # (fh, nf)
    w_col = jnp.zeros((emb, n_pad), jnp.float32)
    for h in range(h_out):
        w_col = w_col.at[h:h + fh, h * nf:(h + 1) * nf].set(wt)
    w_col = w_col.astype(compute_dtype)
    b_col = jnp.zeros((1, n_pad), jnp.float32).at[0, :n].set(
        jnp.tile(bias.astype(jnp.float32), h_out))

    # ---- batch axis: pad to sublanes; split into blocks (parallel axis for v7x) ----
    bsz_pad = ((bsz + 7) // 8) * 8
    bsz_blk = _pick_batch_block(bsz_pad)
    n_batch_blocks = bsz_pad // bsz_blk

    # ---- seq axis: ~512-row MXU chunks; per-grid-step block sized by bytes (~2 MiB) ----
    chunk_rows = min(512, max(bsz_blk, (2 * 1024 * 1024) // (n_blk * 4)))  # bound f32 y
    chunk_seq = min(max(1, chunk_rows // bsz_blk), seq_len)
    bytes_per_chunk = chunk_seq * bsz_blk * emb * itemsize
    target_x_bytes = 2 * 1024 * 1024
    n_chunks = max(1, int(target_x_bytes // bytes_per_chunk))
    seq_tile = chunk_seq * n_chunks
    if seq_tile > seq_len:                     # whole sequence fits in one grid step
        n_chunks = -(-seq_len // chunk_seq)
        seq_tile = chunk_seq * n_chunks
    n_seq_tiles = -(-seq_len // seq_tile)
    seq_pad = n_seq_tiles * seq_tile

    # ---- pad x: zeros on batch (discarded later), REPLICATED rows on seq (max-safe) ----
    xp = x if x.dtype == compute_dtype else x.astype(compute_dtype)  # ideally caller passes bf16
    if bsz_pad != bsz:
        xp = jnp.pad(xp, ((0, 0), (0, bsz_pad - bsz), (0, 0)))
    if seq_pad != seq_len:
        # Duplicated seq positions cannot change a max -> no per-step mask needed and the
        # kernel never touches unspecified out-of-bounds block data.
        xp = jnp.concatenate([xp, xp[:seq_pad - seq_len]], axis=0)

    grid = (n_batch_blocks, n_pad // n_blk, n_seq_tiles)
    out_pad = pl.pallas_call(
        _make_cnn_kernel(chunk_seq, n_chunks, bsz_blk, n_blk),
        out_shape=jax.ShapeDtypeStruct((bsz_pad, n_pad), jnp.float32),
        grid=grid,
        in_specs=[
            pl.BlockSpec((seq_tile, bsz_blk, emb), lambda b, j, k: (k, b, 0)),
            pl.BlockSpec((emb, n_blk), lambda b, j, k: (0, j)),
            pl.BlockSpec((1, n_blk), lambda b, j, k: (0, j)),
        ],
        out_specs=pl.BlockSpec((bsz_blk, n_blk), lambda b, j, k: (b, j)),
        compiler_params=pltpu.CompilerParams(
            dimension_semantics=("parallel", "parallel", "arbitrary")),
    )(xp, w_col, b_col)

    out = out_pad[:bsz, :n].reshape(bsz, h_out, nf)
    if h_out == 1:
        return out[:, 0, :]                    # (bsz, F)  -- matches .squeeze(3).squeeze(2)
    return jnp.transpose(out, (0, 2, 1))       # (bsz, F, h_out)


def cnn_reference(x, weight, bias):
    """Pure-JAX f32 reference mirroring the PyTorch forward (eval mode)."""
    seq_len, bsz, emb = x.shape
    nf, fh = weight.shape
    h_out = emb - fh + 1
    xb = jnp.transpose(x, (1, 2, 0))           # (bsz, emb, seq)
    rows = []
    for h in range(h_out):
        s = jnp.einsum("fk,bks->bfs", weight, xb[:, h:h + fh, :])
        rows.append(jnp.max(s, axis=-1) + bias[None, :])
    out = jnp.stack(rows, axis=-1)             # (bsz, F, h_out)
    if h_out == 1:
        out = out[..., 0]
    return out


if __name__ == "__main__":
    # Small shapes implied by the forward: (seq_len, bsz, emb) input.
    seq_len, bsz, emb = 8, 2, 32
    num_filters, filter_height = 16, 32        # filter_height == emb -> output (bsz, F)

    key = jax.random.PRNGKey(0)
    kx, kw, kb = jax.random.split(key, 3)
    x = jax.random.normal(kx, (seq_len, bsz, emb), dtype=jnp.float32)
    # Conv2d weight is (num_filters, 1, filter_height, 1); stored squeezed as (F, fh).
    weight = jax.random.normal(kw, (num_filters, filter_height), dtype=jnp.float32) * 0.1
    bias = jax.random.normal(kb, (num_filters,), dtype=jnp.float32) * 0.1

    ref = jax.block_until_ready(cnn_reference(x, weight, bias))

    # Default bf16 MXU path (looser tolerance vs the f32 reference).
    out = jax.block_until_ready(cnn_forward(x, weight, bias))
    assert out.shape == (bsz, num_filters), out.shape
    assert jnp.allclose(out, ref, atol=3e-2, rtol=3e-2), "bf16 kernel mismatch vs reference"

    # f32 compute path: tight check that the kernel math is exact.
    out_f32 = jax.block_until_ready(cnn_forward(x, weight, bias, compute_dtype=jnp.float32))
    assert jnp.allclose(out_f32, ref, atol=1e-4, rtol=1e-4), "f32 kernel mismatch vs reference"

    print("KERNEL_OK")
</pallas_src>

<mosaic_0001>
module attributes {stable_mosaic.version = 11 : i64} {
  func.func @kernel(%arg0: i32, %arg1: i32, %arg2: i32, %arg3: memref<8x8x32xbf16, #tpu.memory_space<vmem>>, %arg4: memref<32x128xbf16, #tpu.memory_space<vmem>>, %arg5: memref<1x128xf32, #tpu.memory_space<vmem>>, %arg6: memref<8x128xf32, #tpu.memory_space<vmem>>) attributes {dimension_semantics = [#tpu.dimension_semantics<parallel>, #tpu.dimension_semantics<parallel>, #tpu.dimension_semantics<arbitrary>], iteration_bounds = array<i64: 1, 1, 1>, scalar_prefetch = 0 : i64, scratch_operands = 0 : i64, tpu.core_type = #tpu.core_type<tc>, window_params = [{transform_indices = @transform_0, window_bounds = array<i64: 8, 8, 32>}, {transform_indices = @transform_1, window_bounds = array<i64: 32, 128>}, {transform_indices = @transform_2, window_bounds = array<i64: 1, 128>}, {transform_indices = @transform_3, window_bounds = array<i64: 8, 128>}]} {
    %c0_i32 = arith.constant 0 : i32
    %0 = arith.cmpi eq, %arg2, %c0_i32 : i32
    %1 = arith.extui %0 : i1 to i32
    %c0_i32_0 = arith.constant 0 : i32
    %2 = arith.cmpi ne, %1, %c0_i32_0 : i32
    scf.if %2 {
      %cst_11 = arith.constant 0xFF800000 : f32
      %37 = vector.broadcast %cst_11 : f32 to vector<8x128xf32>
      %c0_12 = arith.constant 0 : index
      %c0_13 = arith.constant 0 : index
      %38 = vector.load %arg6[%c0_12, %c0_13] : memref<8x128xf32, #tpu.memory_space<vmem>>, vector<8x128xf32>
      tpu.vector_store %arg6[%c0_12, %c0_13], %37 {strides = array<i32>} : memref<8x128xf32, #tpu.memory_space<vmem>>, vector<8x128xf32>,
    } else {
    }
    %c0 = arith.constant 0 : index
    %c0_1 = arith.constant 0 : index
    %3 = vector.load %arg4[%c0, %c0_1] : memref<32x128xbf16, #tpu.memory_space<vmem>>, vector<32x128xbf16>
    %c0_2 = arith.constant 0 : index
    %c0_3 = arith.constant 0 : index
    %c0_4 = arith.constant 0 : index
    %4 = vector.load %arg3[%c0_2, %c0_3, %c0_4] : memref<8x8x32xbf16, #tpu.memory_space<vmem>>, vector<8x8x32xbf16>
    %5 = vector.shape_cast %4 : vector<8x8x32xbf16> to vector<64x32xbf16>
    %cst = arith.constant dense<0.000000e+00> : vector<64x128xf32>
    %6 = tpu.matmul %5, %3, %cst {dimension_numbers = #tpu.dot_dimension_numbers<[1], [0], [0], [1], [0, 0, 1, 1], [], []>} : vector<64x32xbf16>, vector<32x128xbf16>, vector<64x128xf32> -> vector<64x128xf32>
    %7 = vector.shape_cast %6 : vector<64x128xf32> to vector<8x8x128xf32>
    %8 = vector.extract_strided_slice %7 {offsets = [0, 0, 0], sizes = [1, 8, 128], strides = [1, 1, 1]} : vector<8x8x128xf32> to vector<1x8x128xf32>
    %9 = vector.shape_cast %8 : vector<1x8x128xf32> to vector<8x128xf32>
    %10 = vector.extract_strided_slice %7 {offsets = [1, 0, 0], sizes = [1, 8, 128], strides = [1, 1, 1]} : vector<8x8x128xf32> to vector<1x8x128xf32>
    %11 = vector.shape_cast %10 : vector<1x8x128xf32> to vector<8x128xf32>
    %12 = vector.extract_strided_slice %7 {offsets = [2, 0, 0], sizes = [1, 8, 128], strides = [1, 1, 1]} : vector<8x8x128xf32> to vector<1x8x128xf32>
    %13 = vector.shape_cast %12 : vector<1x8x128xf32> to vector<8x128xf32>
    %14 = vector.extract_strided_slice %7 {offsets = [3, 0, 0], sizes = [1, 8, 128], strides = [1, 1, 1]} : vector<8x8x128xf32> to vector<1x8x128xf32>
    %15 = vector.shape_cast %14 : vector<1x8x128xf32> to vector<8x128xf32>
    %16 = vector.extract_strided_slice %7 {offsets = [4, 0, 0], sizes = [1, 8, 128], strides = [1, 1, 1]} : vector<8x8x128xf32> to vector<1x8x128xf32>
    %17 = vector.shape_cast %16 : vector<1x8x128xf32> to vector<8x128xf32>
    %18 = vector.extract_strided_slice %7 {offsets = [5, 0, 0], sizes = [1, 8, 128], strides = [1, 1, 1]} : vector<8x8x128xf32> to vector<1x8x128xf32>
    %19 = vector.shape_cast %18 : vector<1x8x128xf32> to vector<8x128xf32>
    %20 = vector.extract_strided_slice %7 {offsets = [6, 0, 0], sizes = [1, 8, 128], strides = [1, 1, 1]} : vector<8x8x128xf32> to vector<1x8x128xf32>
    %21 = vector.shape_cast %20 : vector<1x8x128xf32> to vector<8x128xf32>
    %22 = vector.extract_strided_slice %7 {offsets = [7, 0, 0], sizes = [1, 8, 128], strides = [1, 1, 1]} : vector<8x8x128xf32> to vector<1x8x128xf32>
    %23 = vector.shape_cast %22 : vector<1x8x128xf32> to vector<8x128xf32>
    %24 = arith.maximumf %9, %11 : vector<8x128xf32>
    %25 = arith.maximumf %13, %15 : vector<8x128xf32>
    %26 = arith.maximumf %17, %19 : vector<8x128xf32>
    %27 = arith.maximumf %21, %23 : vector<8x128xf32>
    %28 = arith.maximumf %24, %25 : vector<8x128xf32>
    %29 = arith.maximumf %26, %27 : vector<8x128xf32>
    %30 = arith.maximumf %28, %29 : vector<8x128xf32>
    %c0_5 = arith.constant 0 : index
    %c0_6 = arith.constant 0 : index
    %31 = vector.load %arg6[%c0_5, %c0_6] : memref<8x128xf32, #tpu.memory_space<vmem>>, vector<8x128xf32>
    %32 = arith.maximumf %31, %30 : vector<8x128xf32>
    %c0_7 = arith.constant 0 : index
    %c0_8 = arith.constant 0 : index
    %33 = vector.load %arg6[%c0_7, %c0_8] : memref<8x128xf32, #tpu.memory_space<vmem>>, vector<8x128xf32>
    tpu.vector_store %arg6[%c0_7, %c0_8], %32 {strides = array<i32>} : memref<8x128xf32, #tpu.memory_space<vmem>>, vector<8x128xf32>,
    %c0_i32_9 = arith.constant 0 : i32
    %34 = arith.cmpi eq, %arg2, %c0_i32_9 : i32
    %35 = arith.extui %34 : i1 to i32
    %c0_i32_10 = arith.constant 0 : i32
    %36 = arith.cmpi ne, %35, %c0_i32_10 : i32
    scf.if %36 {
      %c0_11 = arith.constant 0 : index
      %c0_12 = arith.constant 0 : index
      %37 = vector.load %arg6[%c0_11, %c0_12] : memref<8x128xf32, #tpu.memory_space<vmem>>, vector<8x128xf32>
      %c0_13 = arith.constant 0 : index
      %c0_14 = arith.constant 0 : index
      %38 = vector.load %arg5[%c0_13, %c0_14] : memref<1x128xf32, #tpu.memory_space<vmem>>, vector<1x128xf32>
      %39 = vector.broadcast %38 : vector<1x128xf32> to vector<8x128xf32>
      %40 = arith.addf %37, %39 : vector<8x128xf32>
      %c0_15 = arith.constant 0 : index
      %c0_16 = arith.constant 0 : index
      %41 = vector.load %arg6[%c0_15, %c0_16] : memref<8x128xf32, #tpu.memory_space<vmem>>, vector<8x128xf32>
      tpu.vector_store %arg6[%c0_15, %c0_16], %40 {strides = array<i32>} : memref<8x128xf32, #tpu.memory_space<vmem>>, vector<8x128xf32>,
    } else {
    }
    return
  }
  func.func @transform_0(%arg0: i32, %arg1: i32, %arg2: i32) -> (i32, i32, i32) {
    %c0_i32 = arith.constant 0 : i32
    %c0_i32_0 = arith.constant 0 : i32
    return %arg2, %arg0, %c0_i32 : i32, i32, i32
  }
  func.func @transform_1(%arg0: i32, %arg1: i32, %arg2: i32) -> (i32, i32) {
    %c0_i32 = arith.constant 0 : i32
    %c0_i32_0 = arith.constant 0 : i32
    return %c0_i32, %arg1 : i32, i32
  }
  func.func @transform_2(%arg0: i32, %arg1: i32, %arg2: i32) -> (i32, i32) {
    %c0_i32 = arith.constant 0 : i32
    %c0_i32_0 = arith.constant 0 : i32
    return %c0_i32, %arg1 : i32, i32
  }
  func.func @transform_3(%arg0: i32, %arg1: i32, %arg2: i32) -> (i32, i32) {
    %c0_i32 = arith.constant 0 : i32
    return %arg0, %arg1 : i32, i32
  }
}

</mosaic_0001>

<bundles_post_ra>
// kernel: tpu_custom_call.1
= control target key start
LH: loop header
LB: loop body
LE: loop exit
PB: predicated region body
PF: predicated region fallthrough
CT: control target
= control target key end

     0   :  { %8 = vsyncpa [#allocation3], 0  ;;  %s391_s0 = inlined_call_operand.hbm [shape: bf16[8,8,32], index: 0, kind: input, shape index: {}]   ;;  %s392_s1 = inlined_call_operand.hbm [shape: bf16[32,128], index: 1, kind: input, shape index: {}]   ;;  %s393_s2 = inlined_call_operand.vmem [shape: f32[1,128], index: 2, kind: input, shape index: {}]   ;;  %s394_s3 = inlined_call_operand.hbm [shape: f32[8,128], index: 3, kind: output, shape index: {}]  }
   0x1   :  { %9 = vsyncpa [#allocation6], 0 }
   0x2   :  { %10 = vsyncpa [#allocation4], 0  ;;  %s327_s12 = smov [#allocation2]   ;;  %s255_s16 = scalar_lea.hbm %s391_s0, 512 }
   0x3   :  { %s16_s13 = sshll.u32 %s327_s12, 4  ;;  %p256_p0 = scmp.ne.s32.totalorder %s391_s0, %s255_s16  ;;  %s17_s13 = int_to_ptr.vmem [resolvable:$true] %s16_s13 }
   0x4   :  { %p259_p1 = scmp.lt.u32.totalorder %s255_s16, %s391_s0 }
   0x6   :  { %p261_p2 = pnand %p259_p1, %p256_p0 }
   0x8   :  { %264 = shalt.err (!%p261_p2)
}
   0x9   :  { %s265_s21 = scalar_lea.vmem %s17_s13, 512  ;;  %p270_p4 = scmp.lt.s32.totalorder %s17_s13, %s17_s13 }
   0xa   :  { %p266_p3 = scmp.ne.s32.totalorder %s17_s13, %s265_s21  ;;  %p271_p5 = scmp.lt.s32.totalorder %s265_s21, %s265_s21 }
   0xc   :  { %p272_p6 = por %p271_p5, %p270_p4 }
   0xe   :  { %p273_p7 = pnand %p272_p6, %p266_p3 }
  0x10   :  { %276 = shalt.err (!%p273_p7)
}
  0x11   :  { %s328_s22 = smov 64   ;;  %s329_s23 = smov 4  }
  0x12   :  { %22 = dma.hbm_to_vmem [thread:$0]  %s391_s0, 512, %s17_s13, [#allocation3], %s328_s22, %s328_s22, %s329_s23  }
  0x13   :  { %s330_s26 = smov [#allocation5]   ;;  %s277_s30 = scalar_lea.hbm %s392_s1, 256 }
  0x14   :  { %s28_s27 = sshll.u32 %s330_s26, 4  ;;  %p278_p8 = scmp.ne.s32.totalorder %s392_s1, %s277_s30  ;;  %s29_s27 = int_to_ptr.vmem [resolvable:$true] %s28_s27 }
  0x15   :  { %p281_p9 = scmp.lt.u32.totalorder %s277_s30, %s392_s1 }
  0x17   :  { %p283_p10 = pnand %p281_p9, %p278_p8 }
  0x19   :  { %286 = shalt.err (!%p283_p10)
}
  0x1a   :  { %s287_s8 = scalar_lea.vmem %s29_s27, 256  ;;  %p292_p12 = scmp.lt.s32.totalorder %s29_s27, %s29_s27 }
  0x1b   :  { %p288_p11 = scmp.ne.s32.totalorder %s29_s27, %s287_s8  ;;  %p293_p13 = scmp.lt.s32.totalorder %s287_s8, %s287_s8 }
  0x1d   :  { %p294_p0 = por %p293_p13, %p292_p12 }
  0x1f   :  { %p295_p1 = pnand %p294_p0, %p288_p11 }
  0x21   :  { %298 = shalt.err (!%p295_p1)
}
  0x22   :  { %34 = dma.hbm_to_vmem [thread:$0]  %s392_s1, 256, %s29_s27, [#allocation6], %s328_s22, %s328_s22, %s329_s23  }
  0x23   :  { %321 = dma.done.wait [#allocation3], 512  }
  0x24   :  { %322 = vsyncadd [#allocation3], 4294966784 }
  0x25   :  { %323 = dma.done.wait [#allocation6], 256  }
  0x26   :  { %324 = vsyncadd [#allocation6], 4294967040  ;;  %v249_v0 = vld [vmem:[#allocation5] sm:$0xff]   ;;  %v250_v1 = vld [vmem:[#allocation5 + $0x8] sm:$0xff]   ;;  %vm93_vm0 = vcmask 261120   ;;  %s331_s11 = smov [#allocation7]  }
  0x27   :  { %227 = vmatprep.subr.bf16.mxu0 %v249_v0  ;;  %239 = vmatprep.subr.bf16.mxu1 %v249_v0  ;;  %v251_v2 = vld [vmem:[#allocation2] sm:$0xff]   ;;  %v252_v3 = vld [vmem:[#allocation2 + $0x10] sm:$0xff]   ;;  %v253_v4 = vld [vmem:[#allocation2 + $0x8] sm:$0xff]   ;;  %s200_s12 = sshll.u32 %s331_s11, 4  ;;  %s201_s12 = int_to_ptr.vmem [resolvable:$true] %s200_s12 }
  0x28   :  { %228 = vmatpush3.bf16.msra.mxu0 %v249_v0  ;;  %241 = vmatpush3.bf16.msra.mxu1 %v249_v0  ;;  %v254_v5 = vld [vmem:[#allocation2 + $0x18] sm:$0xff]   ;;  %v220_v21 = vld [vmem:[%s393_s2] ss:$0 sm:$0xff]  ;;  %s299_s13 = scalar_lea.vmem %s201_s12, 128  ;;  %p304_p3 = scmp.lt.s32.totalorder %s201_s12, %s201_s12 }
  0x29   :  { %229 = vmatprep.subr.bf16.mxu0 %v250_v1  ;;  %240 = vmatprep.subr.bf16.mxu1 %v250_v1  ;;  %p300_p2 = scmp.ne.s32.totalorder %s201_s12, %s299_s13  ;;  %p305_p4 = scmp.lt.s32.totalorder %s299_s13, %s299_s13 }
  0x2a   :  { %231 = vmatprep.mubr.msk.bf16.mxu0 %vm93_vm0, %v251_v2  ;;  %235 = vmatprep.mubr.msk.bf16.mxu1 %vm93_vm0, %v252_v3 }
  0x2b   :  { %p306_p5 = por %p305_p4, %p304_p3 }
  0x2c   :  { %230 = vmatpush3.bf16.msra.mxu0 %v250_v1  ;;  %242 = vmatpush3.bf16.msra.mxu1 %v250_v1 }
  0x2d   :  { %p307_p6 = pnand %p306_p5, %p300_p2 }
  0x2f   :  { %232 = vmatmul.mubr.msk.bf16.vlgmr.msra.gmra.mrb[0].mxu0 %vm93_vm0, %v253_v4  ;;  %236 = vmatmul.mubr.msk.bf16.vlgmr.msra.gmra.mrb[0].mxu1 %vm93_vm0, %v254_v5 }
 0x102   :  { %v233_v6 = vpop.f32.mrb[0].mxu0  ;;  %v237_v7 = vpop.f32.mrb[0].mxu1 }
 0x103   :  { %v140_v8 = vpop.f32.mrb[1].mxu0  ;;  %v156_v9 = vpop.f32.mrb[1].mxu1 }
 0x104   :  { %v234_v10 = vpop.f32.mrb[2].mxu0  ;;  %v238_v11 = vpop.f32.mrb[2].mxu1 }
 0x105   :  { %v172_v12 = vmax.f32 %v233_v6, %v234_v10  ;;  %v174_v13 = vmax.f32 %v237_v7, %v238_v11  ;;  %v143_v14 = vpop.f32.mrb[3].mxu0  ;;  %v159_v15 = vpop.f32.mrb[3].mxu1 }
 0x106   :  { %v171_v16 = vmax.f32 %v140_v8, %v143_v14  ;;  %v173_v17 = vmax.f32 %v156_v9, %v159_v15 }
 0x108   :  { %v175_v18 = vmax.f32 %v171_v16, %v172_v12  ;;  %v176_v19 = vmax.f32 %v173_v17, %v174_v13 }
 0x10a   :  { %v177_v20 = vmax.f32 %v175_v18, %v176_v19 }
 0x10c   :  { %v192_v22 = vadd.f32 %v220_v21, %v177_v20 }
 0x10e   :  { %193 = vst [vmem:[#allocation7] sm:$0xff] %v192_v22 }
 0x10f   :  { %310 = shalt.err (!%p307_p6)
}
 0x110   :  { %s311_s16 = scalar_lea.hbm %s394_s3, 128 }
 0x111   :  { %p312_p7 = scmp.ne.s32.totalorder %s394_s3, %s311_s16  ;;  %p315_p8 = scmp.lt.u32.totalorder %s311_s16, %s394_s3 }
 0x113   :  { %p317_p9 = pnand %p315_p8, %p312_p7 }
 0x115   :  { %320 = shalt.err (!%p317_p9)
}
 0x116   :  { %203 = dma.vmem_to_hbm [thread:$0]  %s201_s12, 128, %s394_s3, [#allocation4]  }
 0x117   :  { %325 = dma.done.wait [#allocation4], 128  }
 0x118   :  { %326 = vsyncadd [#allocation4], 4294967168 }
 0x119   :  { %207 = vsyncpa [#allocation3], 1 }
 0x11a   :  { %208 = vsyncpa [#allocation6], 1 }
 0x11b   :  { %209 = vsyncpa [#allocation4], 1 }

</bundles_post_ra>
